<compile_context>
chip_gen: v7x
topology: tpu7x:2x2x1
jax: 0.10.0
libtpu: 0.0.40
codegen_flags: <defaults>
</compile_context>

<pallas_src>
import jax
import jax.numpy as jnp
from jax.experimental import pallas as pl
from jax.experimental.pallas import tpu as pltpu


_TARGET_ROWS = 1024        # rows per block (multiple of 8/16/32 -> legal tiles)
_VMEM_LIMIT = 32 << 20     # scoped-VMEM budget: fits v5e/v6e/v7x physical VMEM
_JNP_FALLBACK_ELEMS = 1024  # below this, launch/DMA overhead dwarfs real traffic


def _make_kernel(mask_dtype):
    def kernel(x_ref, add_ref, sub_ref, mul_ref, div_ref, eq_ref, lt_ref, gt_ref):
        x = x_ref[...]
        add_ref[...] = x + 2.0
        sub_ref[...] = x - 2.0
        mul_ref[...] = x * 2.0
        div_ref[...] = x * 0.5          # exact: multiply by a power of two
        eq_ref[...] = (x == 2.0).astype(mask_dtype)
        lt_ref[...] = (x < 2.0).astype(mask_dtype)
        gt_ref[...] = (x > 2.0).astype(mask_dtype)
    return kernel


def _run_pallas(x2d, tr, mask_dtype):
    rows, lane = x2d.shape
    grid = (pl.cdiv(rows, tr),)                    # ragged last block is masked
    spec = pl.BlockSpec((tr, lane), lambda i: (i, 0))
    val = jax.ShapeDtypeStruct((rows, lane), x2d.dtype)
    msk = jax.ShapeDtypeStruct((rows, lane), mask_dtype)
    return pl.pallas_call(
        _make_kernel(mask_dtype),
        out_shape=(val, val, val, val, msk, msk, msk),
        grid=grid,
        in_specs=[spec],
        out_specs=(spec, spec, spec, spec, spec, spec, spec),
        compiler_params=pltpu.CompilerParams(
            dimension_semantics=("parallel",),     # shard row loop across TCs
            vmem_limit_bytes=_VMEM_LIMIT),
    )(x2d)


def pt_module_forward(x):
    if not jnp.issubdtype(x.dtype, jnp.floating):
        # TODO(synk): exact torch integer type-promotion (int add/sub/mul stay int,
        # true-division returns float); here everything is computed in float32.
        x = x.astype(jnp.float32)
    orig_shape = x.shape
    n = x.size

    def _jnp_path(v):
        return (v + 2, v - 2, v * 2, v / 2, v == 2, v < 2, v > 2)

    # Tiny or non-128-aligned inputs: one fused XLA elementwise pass is strictly
    # cheaper than a pallas launch plus pad/unpad copies.
    if n < _JNP_FALLBACK_ELEMS or n % 128 != 0:
        return _jnp_path(x)

    # Lane-dense slab with no padding: lane always divides n exactly.
    lane = 512 if n % 512 == 0 else (256 if n % 256 == 0 else 128)
    rows = n // lane
    tr = min(rows, _TARGET_ROWS)          # full extent if small, else 1024 rows
    x2d = x.reshape(rows, lane)           # contiguous reshape: no copy

    try:
        add_r, sub_r, mul_r, div_r, eq_r, lt_r, gt_r = _run_pallas(
            x2d, tr, jnp.bool_)           # masks emitted as bool: no extra pass
    except Exception:
        # Fallback for Mosaic builds that reject bool vector stores.
        add_r, sub_r, mul_r, div_r, eq_r, lt_r, gt_r = _run_pallas(
            x2d, tr, jnp.int8)
        eq_r = eq_r.astype(jnp.bool_)
        lt_r = lt_r.astype(jnp.bool_)
        gt_r = gt_r.astype(jnp.bool_)

    def rs(a):
        return a.reshape(orig_shape)      # contiguous reshape: no copy

    return (rs(add_r), rs(sub_r), rs(mul_r), rs(div_r),
            rs(eq_r), rs(lt_r), rs(gt_r))


if __name__ == "__main__":
    key = jax.random.PRNGKey(0)
    # Small NCHW input: batch=2, channels=4, spatial=16x16 (2048 elements,
    # large enough to exercise the Pallas path).
    x = jax.random.normal(key, (2, 4, 16, 16), dtype=jnp.float32)
    # Inject a few exact 2.0 values so the eq mask has hits.
    x = x.at[0, 0, 0, :4].set(2.0)

    outs = pt_module_forward(x)
    outs = jax.block_until_ready(outs)

    # Correctness check against plain JAX reference.
    ref = (x + 2, x - 2, x * 2, x / 2, x == 2, x < 2, x > 2)
    for got, want in zip(outs, ref):
        assert got.shape == want.shape, (got.shape, want.shape)
        assert got.dtype == want.dtype, (got.dtype, want.dtype)
        if got.dtype == jnp.bool_:
            assert bool(jnp.array_equal(got, want))
        else:
            assert bool(jnp.allclose(got, want))

    print("KERNEL_OK")
</pallas_src>

<mosaic_0001>
module attributes {stable_mosaic.version = 11 : i64} {
  func.func @kernel(%arg0: i32, %arg1: memref<4x512xf32, #tpu.memory_space<vmem>>, %arg2: memref<4x512xf32, #tpu.memory_space<vmem>>, %arg3: memref<4x512xf32, #tpu.memory_space<vmem>>, %arg4: memref<4x512xf32, #tpu.memory_space<vmem>>, %arg5: memref<4x512xf32, #tpu.memory_space<vmem>>, %arg6: memref<4x512xi32, #tpu.memory_space<vmem>>, %arg7: memref<4x512xi32, #tpu.memory_space<vmem>>, %arg8: memref<4x512xi32, #tpu.memory_space<vmem>>) attributes {dimension_semantics = [#tpu.dimension_semantics<parallel>], iteration_bounds = array<i64: 1>, scalar_prefetch = 0 : i64, scratch_operands = 0 : i64, tpu.core_type = #tpu.core_type<tc>, window_params = [{transform_indices = @transform_0, window_bounds = array<i64: 4, 512>}, {transform_indices = @transform_1, window_bounds = array<i64: 4, 512>}, {transform_indices = @transform_2, window_bounds = array<i64: 4, 512>}, {transform_indices = @transform_3, window_bounds = array<i64: 4, 512>}, {transform_indices = @transform_4, window_bounds = array<i64: 4, 512>}, {transform_indices = @transform_5, window_bounds = array<i64: 4, 512>}, {transform_indices = @transform_6, window_bounds = array<i64: 4, 512>}, {transform_indices = @transform_7, window_bounds = array<i64: 4, 512>}]} {
    %c0 = arith.constant 0 : index
    %c0_0 = arith.constant 0 : index
    %0 = vector.load %arg1[%c0, %c0_0] : memref<4x512xf32, #tpu.memory_space<vmem>>, vector<4x512xf32>
    %cst = arith.constant 2.000000e+00 : f32
    %1 = vector.broadcast %cst : f32 to vector<4x512xf32>
    %2 = arith.addf %0, %1 : vector<4x512xf32>
    %c0_1 = arith.constant 0 : index
    %c0_2 = arith.constant 0 : index
    %3 = vector.load %arg2[%c0_1, %c0_2] : memref<4x512xf32, #tpu.memory_space<vmem>>, vector<4x512xf32>
    tpu.vector_store %arg2[%c0_1, %c0_2], %2 {strides = array<i32>} : memref<4x512xf32, #tpu.memory_space<vmem>>, vector<4x512xf32>,
    %cst_3 = arith.constant 2.000000e+00 : f32
    %4 = vector.broadcast %cst_3 : f32 to vector<4x512xf32>
    %5 = arith.subf %0, %4 : vector<4x512xf32>
    %c0_4 = arith.constant 0 : index
    %c0_5 = arith.constant 0 : index
    %6 = vector.load %arg3[%c0_4, %c0_5] : memref<4x512xf32, #tpu.memory_space<vmem>>, vector<4x512xf32>
    tpu.vector_store %arg3[%c0_4, %c0_5], %5 {strides = array<i32>} : memref<4x512xf32, #tpu.memory_space<vmem>>, vector<4x512xf32>,
    %cst_6 = arith.constant 2.000000e+00 : f32
    %7 = vector.broadcast %cst_6 : f32 to vector<4x512xf32>
    %8 = arith.mulf %0, %7 : vector<4x512xf32>
    %c0_7 = arith.constant 0 : index
    %c0_8 = arith.constant 0 : index
    %9 = vector.load %arg4[%c0_7, %c0_8] : memref<4x512xf32, #tpu.memory_space<vmem>>, vector<4x512xf32>
    tpu.vector_store %arg4[%c0_7, %c0_8], %8 {strides = array<i32>} : memref<4x512xf32, #tpu.memory_space<vmem>>, vector<4x512xf32>,
    %cst_9 = arith.constant 5.000000e-01 : f32
    %10 = vector.broadcast %cst_9 : f32 to vector<4x512xf32>
    %11 = arith.mulf %0, %10 : vector<4x512xf32>
    %c0_10 = arith.constant 0 : index
    %c0_11 = arith.constant 0 : index
    %12 = vector.load %arg5[%c0_10, %c0_11] : memref<4x512xf32, #tpu.memory_space<vmem>>, vector<4x512xf32>
    tpu.vector_store %arg5[%c0_10, %c0_11], %11 {strides = array<i32>} : memref<4x512xf32, #tpu.memory_space<vmem>>, vector<4x512xf32>,
    %cst_12 = arith.constant 2.000000e+00 : f32
    %13 = vector.broadcast %cst_12 : f32 to vector<4x512xf32>
    %14 = arith.cmpf oeq, %0, %13 : vector<4x512xf32>
    %c0_13 = arith.constant 0 : index
    %c0_14 = arith.constant 0 : index
    %15 = vector.load %arg6[%c0_13, %c0_14] : memref<4x512xi32, #tpu.memory_space<vmem>>, vector<4x512xi32>
    %16 = arith.extui %14 : vector<4x512xi1> to vector<4x512xi32>
    %cst_15 = arith.constant dense<0> : vector<4x512xi32>
    %17 = arith.cmpi ne, %15, %cst_15 : vector<4x512xi32>
    tpu.vector_store %arg6[%c0_13, %c0_14], %16 {strides = array<i32>} : memref<4x512xi32, #tpu.memory_space<vmem>>, vector<4x512xi32>,
    %cst_16 = arith.constant 2.000000e+00 : f32
    %18 = vector.broadcast %cst_16 : f32 to vector<4x512xf32>
    %19 = arith.cmpf olt, %0, %18 : vector<4x512xf32>
    %c0_17 = arith.constant 0 : index
    %c0_18 = arith.constant 0 : index
    %20 = vector.load %arg7[%c0_17, %c0_18] : memref<4x512xi32, #tpu.memory_space<vmem>>, vector<4x512xi32>
    %21 = arith.extui %19 : vector<4x512xi1> to vector<4x512xi32>
    %cst_19 = arith.constant dense<0> : vector<4x512xi32>
    %22 = arith.cmpi ne, %20, %cst_19 : vector<4x512xi32>
    tpu.vector_store %arg7[%c0_17, %c0_18], %21 {strides = array<i32>} : memref<4x512xi32, #tpu.memory_space<vmem>>, vector<4x512xi32>,
    %cst_20 = arith.constant 2.000000e+00 : f32
    %23 = vector.broadcast %cst_20 : f32 to vector<4x512xf32>
    %24 = arith.cmpf ogt, %0, %23 : vector<4x512xf32>
    %c0_21 = arith.constant 0 : index
    %c0_22 = arith.constant 0 : index
    %25 = vector.load %arg8[%c0_21, %c0_22] : memref<4x512xi32, #tpu.memory_space<vmem>>, vector<4x512xi32>
    %26 = arith.extui %24 : vector<4x512xi1> to vector<4x512xi32>
    %cst_23 = arith.constant dense<0> : vector<4x512xi32>
    %27 = arith.cmpi ne, %25, %cst_23 : vector<4x512xi32>
    tpu.vector_store %arg8[%c0_21, %c0_22], %26 {strides = array<i32>} : memref<4x512xi32, #tpu.memory_space<vmem>>, vector<4x512xi32>,
    return
  }
  func.func @transform_0(%arg0: i32) -> (i32, i32) {
    %c0_i32 = arith.constant 0 : i32
    %c0_i32_0 = arith.constant 0 : i32
    return %arg0, %c0_i32 : i32, i32
  }
  func.func @transform_1(%arg0: i32) -> (i32, i32) {
    %c0_i32 = arith.constant 0 : i32
    %c0_i32_0 = arith.constant 0 : i32
    return %arg0, %c0_i32 : i32, i32
  }
  func.func @transform_2(%arg0: i32) -> (i32, i32) {
    %c0_i32 = arith.constant 0 : i32
    %c0_i32_0 = arith.constant 0 : i32
    return %arg0, %c0_i32 : i32, i32
  }
  func.func @transform_3(%arg0: i32) -> (i32, i32) {
    %c0_i32 = arith.constant 0 : i32
    %c0_i32_0 = arith.constant 0 : i32
    return %arg0, %c0_i32 : i32, i32
  }
  func.func @transform_4(%arg0: i32) -> (i32, i32) {
    %c0_i32 = arith.constant 0 : i32
    %c0_i32_0 = arith.constant 0 : i32
    return %arg0, %c0_i32 : i32, i32
  }
  func.func @transform_5(%arg0: i32) -> (i32, i32) {
    %c0_i32 = arith.constant 0 : i32
    %c0_i32_0 = arith.constant 0 : i32
    return %arg0, %c0_i32 : i32, i32
  }
  func.func @transform_6(%arg0: i32) -> (i32, i32) {
    %c0_i32 = arith.constant 0 : i32
    %c0_i32_0 = arith.constant 0 : i32
    return %arg0, %c0_i32 : i32, i32
  }
  func.func @transform_7(%arg0: i32) -> (i32, i32) {
    %c0_i32 = arith.constant 0 : i32
    %c0_i32_0 = arith.constant 0 : i32
    return %arg0, %c0_i32 : i32, i32
  }
}

module attributes {stable_mosaic.version = 11 : i64} {
  func.func @kernel(%arg0: i32, %arg1: memref<4x512xf32, #tpu.memory_space<vmem>>, %arg2: memref<4x512xf32, #tpu.memory_space<vmem>>, %arg3: memref<4x512xf32, #tpu.memory_space<vmem>>, %arg4: memref<4x512xf32, #tpu.memory_space<vmem>>, %arg5: memref<4x512xf32, #tpu.memory_space<vmem>>, %arg6: memref<4x512xi8, #tpu.memory_space<vmem>>, %arg7: memref<4x512xi8, #tpu.memory_space<vmem>>, %arg8: memref<4x512xi8, #tpu.memory_space<vmem>>) attributes {dimension_semantics = [#tpu.dimension_semantics<parallel>], iteration_bounds = array<i64: 1>, scalar_prefetch = 0 : i64, scratch_operands = 0 : i64, tpu.core_type = #tpu.core_type<tc>, window_params = [{transform_indices = @transform_0, window_bounds = array<i64: 4, 512>}, {transform_indices = @transform_1, window_bounds = array<i64: 4, 512>}, {transform_indices = @transform_2, window_bounds = array<i64: 4, 512>}, {transform_indices = @transform_3, window_bounds = array<i64: 4, 512>}, {transform_indices = @transform_4, window_bounds = array<i64: 4, 512>}, {transform_indices = @transform_5, window_bounds = array<i64: 4, 512>}, {transform_indices = @transform_6, window_bounds = array<i64: 4, 512>}, {transform_indices = @transform_7, window_bounds = array<i64: 4, 512>}]} {
    %c0 = arith.constant 0 : index
    %c0_0 = arith.constant 0 : index
    %0 = vector.load %arg1[%c0, %c0_0] : memref<4x512xf32, #tpu.memory_space<vmem>>, vector<4x512xf32>
    %cst = arith.constant 2.000000e+00 : f32
    %1 = vector.broadcast %cst : f32 to vector<4x512xf32>
    %2 = arith.addf %0, %1 : vector<4x512xf32>
    %c0_1 = arith.constant 0 : index
    %c0_2 = arith.constant 0 : index
    %3 = vector.load %arg2[%c0_1, %c0_2] : memref<4x512xf32, #tpu.memory_space<vmem>>, vector<4x512xf32>
    tpu.vector_store %arg2[%c0_1, %c0_2], %2 {strides = array<i32>} : memref<4x512xf32, #tpu.memory_space<vmem>>, vector<4x512xf32>,
    %cst_3 = arith.constant 2.000000e+00 : f32
    %4 = vector.broadcast %cst_3 : f32 to vector<4x512xf32>
    %5 = arith.subf %0, %4 : vector<4x512xf32>
    %c0_4 = arith.constant 0 : index
    %c0_5 = arith.constant 0 : index
    %6 = vector.load %arg3[%c0_4, %c0_5] : memref<4x512xf32, #tpu.memory_space<vmem>>, vector<4x512xf32>
    tpu.vector_store %arg3[%c0_4, %c0_5], %5 {strides = array<i32>} : memref<4x512xf32, #tpu.memory_space<vmem>>, vector<4x512xf32>,
    %cst_6 = arith.constant 2.000000e+00 : f32
    %7 = vector.broadcast %cst_6 : f32 to vector<4x512xf32>
    %8 = arith.mulf %0, %7 : vector<4x512xf32>
    %c0_7 = arith.constant 0 : index
    %c0_8 = arith.constant 0 : index
    %9 = vector.load %arg4[%c0_7, %c0_8] : memref<4x512xf32, #tpu.memory_space<vmem>>, vector<4x512xf32>
    tpu.vector_store %arg4[%c0_7, %c0_8], %8 {strides = array<i32>} : memref<4x512xf32, #tpu.memory_space<vmem>>, vector<4x512xf32>,
    %cst_9 = arith.constant 5.000000e-01 : f32
    %10 = vector.broadcast %cst_9 : f32 to vector<4x512xf32>
    %11 = arith.mulf %0, %10 : vector<4x512xf32>
    %c0_10 = arith.constant 0 : index
    %c0_11 = arith.constant 0 : index
    %12 = vector.load %arg5[%c0_10, %c0_11] : memref<4x512xf32, #tpu.memory_space<vmem>>, vector<4x512xf32>
    tpu.vector_store %arg5[%c0_10, %c0_11], %11 {strides = array<i32>} : memref<4x512xf32, #tpu.memory_space<vmem>>, vector<4x512xf32>,
    %cst_12 = arith.constant 2.000000e+00 : f32
    %13 = vector.broadcast %cst_12 : f32 to vector<4x512xf32>
    %14 = arith.cmpf oeq, %0, %13 : vector<4x512xf32>
    %15 = arith.extui %14 : vector<4x512xi1> to vector<4x512xi8>
    %c0_13 = arith.constant 0 : index
    %c0_14 = arith.constant 0 : index
    %16 = vector.load %arg6[%c0_13, %c0_14] : memref<4x512xi8, #tpu.memory_space<vmem>>, vector<4x512xi8>
    tpu.vector_store %arg6[%c0_13, %c0_14], %15 {strides = array<i32>} : memref<4x512xi8, #tpu.memory_space<vmem>>, vector<4x512xi8>,
    %cst_15 = arith.constant 2.000000e+00 : f32
    %17 = vector.broadcast %cst_15 : f32 to vector<4x512xf32>
    %18 = arith.cmpf olt, %0, %17 : vector<4x512xf32>
    %19 = arith.extui %18 : vector<4x512xi1> to vector<4x512xi8>
    %c0_16 = arith.constant 0 : index
    %c0_17 = arith.constant 0 : index
    %20 = vector.load %arg7[%c0_16, %c0_17] : memref<4x512xi8, #tpu.memory_space<vmem>>, vector<4x512xi8>
    tpu.vector_store %arg7[%c0_16, %c0_17], %19 {strides = array<i32>} : memref<4x512xi8, #tpu.memory_space<vmem>>, vector<4x512xi8>,
    %cst_18 = arith.constant 2.000000e+00 : f32
    %21 = vector.broadcast %cst_18 : f32 to vector<4x512xf32>
    %22 = arith.cmpf ogt, %0, %21 : vector<4x512xf32>
    %23 = arith.extui %22 : vector<4x512xi1> to vector<4x512xi8>
    %c0_19 = arith.constant 0 : index
    %c0_20 = arith.constant 0 : index
    %24 = vector.load %arg8[%c0_19, %c0_20] : memref<4x512xi8, #tpu.memory_space<vmem>>, vector<4x512xi8>
    tpu.vector_store %arg8[%c0_19, %c0_20], %23 {strides = array<i32>} : memref<4x512xi8, #tpu.memory_space<vmem>>, vector<4x512xi8>,
    return
  }
  func.func @transform_0(%arg0: i32) -> (i32, i32) {
    %c0_i32 = arith.constant 0 : i32
    %c0_i32_0 = arith.constant 0 : i32
    return %arg0, %c0_i32 : i32, i32
  }
  func.func @transform_1(%arg0: i32) -> (i32, i32) {
    %c0_i32 = arith.constant 0 : i32
    %c0_i32_0 = arith.constant 0 : i32
    return %arg0, %c0_i32 : i32, i32
  }
  func.func @transform_2(%arg0: i32) -> (i32, i32) {
    %c0_i32 = arith.constant 0 : i32
    %c0_i32_0 = arith.constant 0 : i32
    return %arg0, %c0_i32 : i32, i32
  }
  func.func @transform_3(%arg0: i32) -> (i32, i32) {
    %c0_i32 = arith.constant 0 : i32
    %c0_i32_0 = arith.constant 0 : i32
    return %arg0, %c0_i32 : i32, i32
  }
  func.func @transform_4(%arg0: i32) -> (i32, i32) {
    %c0_i32 = arith.constant 0 : i32
    %c0_i32_0 = arith.constant 0 : i32
    return %arg0, %c0_i32 : i32, i32
  }
  func.func @transform_5(%arg0: i32) -> (i32, i32) {
    %c0_i32 = arith.constant 0 : i32
    %c0_i32_0 = arith.constant 0 : i32
    return %arg0, %c0_i32 : i32, i32
  }
  func.func @transform_6(%arg0: i32) -> (i32, i32) {
    %c0_i32 = arith.constant 0 : i32
    %c0_i32_0 = arith.constant 0 : i32
    return %arg0, %c0_i32 : i32, i32
  }
  func.func @transform_7(%arg0: i32) -> (i32, i32) {
    %c0_i32 = arith.constant 0 : i32
    %c0_i32_0 = arith.constant 0 : i32
    return %arg0, %c0_i32 : i32, i32
  }
}

</mosaic_0001>

<bundles_post_ra>
// kernel: tpu_custom_call.1
= control target key start
LH: loop header
LB: loop body
LE: loop exit
PB: predicated region body
PF: predicated region fallthrough
CT: control target
= control target key end

     0   :  { %13 = vsyncpa [#allocation3], 0  ;;  %s438_s0 = inlined_call_operand.hbm [shape: f32[4,512], index: 0, kind: input, shape index: {}]   ;;  %s439_s1 = inlined_call_operand.hbm [shape: f32[4,512], index: 1, kind: output, shape index: {0}]   ;;  %s440_s2 = inlined_call_operand.hbm [shape: f32[4,512], index: 2, kind: output, shape index: {1}]   ;;  %s441_s3 = inlined_call_operand.hbm [shape: f32[4,512], index: 3, kind: output, shape index: {2}]   ;;  %s442_s4 = inlined_call_operand.hbm [shape: f32[4,512], index: 4, kind: output, shape index: {3}]   ;;  %s443_s5 = inlined_call_operand.vmem [shape: s32[4,512], index: 5, kind: output, shape index: {4}]   ;;  %s444_s6 = inlined_call_operand.vmem [shape: s32[4,512], index: 6, kind: output, shape index: {5}]   ;;  %s445_s7 = inlined_call_operand.vmem [shape: s32[4,512], index: 7, kind: output, shape index: {6}]  }
   0x1   :  { %14 = vsyncpa [#allocation4], 0 }
   0x2   :  { %15 = vsyncpa [#allocation7], 0 }
   0x3   :  { %16 = vsyncpa [#allocation10], 0  ;;  %s260_s24 = smov [#allocation2]   ;;  %s142_s28 = scalar_lea.hbm %s438_s0, 256 }
   0x4   :  { %s23_s25 = sshll.u32 %s260_s24, 4  ;;  %p143_p0 = scmp.ne.s32.totalorder %s438_s0, %s142_s28  ;;  %s24_s25 = int_to_ptr.vmem [resolvable:$true] %s23_s25 }
   0x5   :  { %p146_p1 = scmp.lt.u32.totalorder %s142_s28, %s438_s0 }
   0x7   :  { %p148_p2 = pnand %p146_p1, %p143_p0 }
   0x9   :  { %151 = shalt.err (!%p148_p2)
}
   0xa   :  { %s152_s10 = scalar_lea.vmem %s24_s25, 256  ;;  %p157_p4 = scmp.lt.s32.totalorder %s24_s25, %s24_s25 }
   0xb   :  { %p153_p3 = scmp.ne.s32.totalorder %s24_s25, %s152_s10  ;;  %p158_p5 = scmp.lt.s32.totalorder %s152_s10, %s152_s10 }
   0xd   :  { %p159_p6 = por %p158_p5, %p157_p4 }
   0xf   :  { %p160_p7 = pnand %p159_p6, %p153_p3 }
  0x11   :  { %163 = shalt.err (!%p160_p7)
}
  0x12   :  { %26 = dma.hbm_to_vmem [thread:$0]  %s438_s0, 256, %s24_s25, [#allocation3]  }
  0x13   :  { %252 = dma.done.wait [#allocation3], 256  }
  0x14   :  { %253 = vsyncadd [#allocation3], 4294967040  ;;  %s261_s13 = smov [#allocation6]   ;;  %s262_s15 = smov [#allocation5]   ;;  %v318_v0 = vld [vmem:[#allocation2] sm:$0xff]  ;;  %v320_v1 = vld [vmem:[#allocation2 + $0x8] sm:$0xff] }
  0x15   :  { %s82_s14 = sshll.u32 %s261_s13, 4  ;;  %s72_s16 = sshll.u32 %s262_s15, 4  ;;  %v134_v2 = vadd.f32 -2.0, %v318_v0  ;;  %v135_v3 = vadd.f32 -2.0, %v320_v1  ;;  %v32_v4 = vadd.f32 2.0, %v318_v0  ;;  %v33_v5 = vadd.f32 2.0, %v320_v1  ;;  %s326_s14 = int_to_ptr.vmem [resolvable:$true] %s82_s14  ;;  %s332_s16 = int_to_ptr.vmem [resolvable:$true] %s72_s16 }
  0x16   :  { %s263_s17 = smov [#allocation8]   ;;  %s264_s19 = smov [#allocation9]   ;;  %v40_v6 = vmul.f32 2.0, %v318_v0  ;;  %v41_v7 = vmul.f32 2.0, %v320_v1  ;;  %v44_v8 = vmul.f32 0.5, %v318_v0  ;;  %v45_v9 = vmul.f32 0.5, %v320_v1 }
  0x17   :  { %s92_s18 = sshll.u32 %s263_s17, 4  ;;  %s102_s20 = sshll.u32 %s264_s19, 4  ;;  %38 = vst [vmem:[#allocation6] sm:$0xff] %v134_v2  ;;  %39 = vst [vmem:[#allocation6 + $0x8] sm:$0xff] %v135_v3  ;;  %vm48_vm0 = vcmp.eq.f32.partialorder %v318_v0, 2.0  ;;  %vm49_vm1 = vcmp.eq.f32.partialorder %v320_v1, 2.0  ;;  %s338_s18 = int_to_ptr.vmem [resolvable:$true] %s92_s18  ;;  %s340_s20 = int_to_ptr.vmem [resolvable:$true] %s102_s20 }
  0x18   :  { %34 = vst [vmem:[#allocation5] sm:$0xff] %v32_v4  ;;  %35 = vst [vmem:[#allocation5 + $0x8] sm:$0xff] %v33_v5  ;;  %vm54_vm2 = vcmp.lt.f32.partialorder %v318_v0, 2.0  ;;  %vm55_vm3 = vcmp.lt.f32.partialorder %v320_v1, 2.0  ;;  %s164_s0 = scalar_lea.vmem %s326_s14, 256  ;;  %p169_p9 = scmp.lt.s32.totalorder %s326_s14, %s326_s14 }
  0x19   :  { %42 = vst [vmem:[#allocation8] sm:$0xff] %v40_v6  ;;  %43 = vst [vmem:[#allocation8 + $0x8] sm:$0xff] %v41_v7  ;;  %p165_p8 = scmp.ne.s32.totalorder %s326_s14, %s164_s0  ;;  %p170_p10 = scmp.lt.s32.totalorder %s164_s0, %s164_s0 }
  0x1a   :  { %46 = vst [vmem:[#allocation9] sm:$0xff] %v44_v8  ;;  %47 = vst [vmem:[#allocation9 + $0x8] sm:$0xff] %v45_v9 }
  0x1b   :  { %p171_p11 = por %p170_p10, %p169_p9 }
  0x1d   :  { %p172_p12 = pnand %p171_p11, %p165_p8 }
  0x1f   :  { %175 = shalt.err (!%p172_p12)
}
  0x20   :  { %s176_s23 = scalar_lea.hbm %s440_s2, 256 }
  0x21   :  { %p177_p13 = scmp.ne.s32.totalorder %s440_s2, %s176_s23  ;;  %p180_p0 = scmp.lt.u32.totalorder %s176_s23, %s440_s2 }
  0x23   :  { %p182_p1 = pnand %p180_p0, %p177_p13 }
  0x25   :  { %185 = shalt.err (!%p182_p1)
}
  0x26   :  { %85 = dma.vmem_to_hbm [thread:$0]  %s326_s14, 256, %s440_s2, [#allocation7]   ;;  %v265_v10 = vmov 0   ;;  %vm60_vm4 = vcmp.gt.f32.partialorder %v318_v0, 2.0  ;;  %vm61_vm5 = vcmp.gt.f32.partialorder %v320_v1, 2.0 }
  0x27   :  { %v50_v11 = vsel %vm48_vm0, 1, %v265_v10  ;;  %v51_v12 = vsel %vm49_vm1, 1, %v265_v10  ;;  %v56_v13 = vsel %vm54_vm2, 1, %v265_v10  ;;  %v57_v14 = vsel %vm55_vm3, 1, %v265_v10  ;;  %s186_s14 = scalar_lea.vmem %s332_s16, 256  ;;  %p191_p3 = scmp.lt.s32.totalorder %s332_s16, %s332_s16 }
  0x28   :  { %52 = vst [vmem:[%s443_s5] sm:$0xff] %v50_v11  ;;  %53 = vst [vmem:[%s443_s5 + $0x8] sm:$0xff] %v51_v12  ;;  %p187_p2 = scmp.ne.s32.totalorder %s332_s16, %s186_s14  ;;  %p192_p4 = scmp.lt.s32.totalorder %s186_s14, %s186_s14 }
  0x29   :  { %58 = vst [vmem:[%s444_s6] sm:$0xff] %v56_v13  ;;  %59 = vst [vmem:[%s444_s6 + $0x8] sm:$0xff] %v57_v14 }
  0x2a   :  { %p193_p5 = por %p192_p4, %p191_p3 }
  0x2c   :  { %p194_p6 = pnand %p193_p5, %p187_p2 }
  0x2e   :  { %197 = shalt.err (!%p194_p6)
}
  0x2f   :  { %s198_s17 = scalar_lea.hbm %s439_s1, 256 }
  0x30   :  { %p199_p7 = scmp.ne.s32.totalorder %s439_s1, %s198_s17  ;;  %p202_p8 = scmp.lt.u32.totalorder %s198_s17, %s439_s1 }
  0x32   :  { %p204_p9 = pnand %p202_p8, %p199_p7 }
  0x34   :  { %207 = shalt.err (!%p204_p9)
}
  0x35   :  { %75 = dma.vmem_to_hbm [thread:$0]  %s332_s16, 256, %s439_s1, [#allocation4]   ;;  %v62_v15 = vsel %vm60_vm4, 1, %v265_v10  ;;  %v63_v16 = vsel %vm61_vm5, 1, %v265_v10 }
  0x36   :  { %s208_s24 = scalar_lea.vmem %s338_s18, 256  ;;  %p213_p11 = scmp.lt.s32.totalorder %s338_s18, %s338_s18 }
  0x37   :  { %p209_p10 = scmp.ne.s32.totalorder %s338_s18, %s208_s24  ;;  %p214_p12 = scmp.lt.s32.totalorder %s208_s24, %s208_s24 }
  0x39   :  { %p215_p13 = por %p214_p12, %p213_p11 }
  0x3b   :  { %p216_p0 = pnand %p215_p13, %p209_p10 }
  0x3d   :  { %219 = shalt.err (!%p216_p0)
}
  0x3e   :  { %s220_s27 = scalar_lea.hbm %s441_s3, 256 }
  0x3f   :  { %p221_p1 = scmp.ne.s32.totalorder %s441_s3, %s220_s27  ;;  %p224_p2 = scmp.lt.u32.totalorder %s220_s27, %s441_s3 }
  0x41   :  { %p226_p3 = pnand %p224_p2, %p221_p1 }
  0x43   :  { %229 = shalt.err (!%p226_p3)
}
  0x44   :  { %95 = dma.vmem_to_hbm [thread:$0]  %s338_s18, 256, %s441_s3, [#allocation7]   ;;  %64 = vst [vmem:[%s445_s7] sm:$0xff] %v62_v15  ;;  %65 = vst [vmem:[%s445_s7 + $0x8] sm:$0xff] %v63_v16 }
  0x45   :  { %s230_s12 = scalar_lea.vmem %s340_s20, 256  ;;  %p235_p5 = scmp.lt.s32.totalorder %s340_s20, %s340_s20 }
  0x46   :  { %p231_p4 = scmp.ne.s32.totalorder %s340_s20, %s230_s12  ;;  %p236_p6 = scmp.lt.s32.totalorder %s230_s12, %s230_s12 }
  0x48   :  { %p237_p7 = por %p236_p6, %p235_p5 }
  0x4a   :  { %p238_p8 = pnand %p237_p7, %p231_p4 }
  0x4c   :  { %241 = shalt.err (!%p238_p8)
}
  0x4d   :  { %s242_s3 = scalar_lea.hbm %s442_s4, 256 }
  0x4e   :  { %p243_p9 = scmp.ne.s32.totalorder %s442_s4, %s242_s3  ;;  %p246_p10 = scmp.lt.u32.totalorder %s242_s3, %s442_s4 }
  0x50   :  { %p248_p11 = pnand %p246_p10, %p243_p9 }
  0x52   :  { %251 = shalt.err (!%p248_p11)
}
  0x53   :  { %105 = dma.vmem_to_hbm [thread:$0]  %s340_s20, 256, %s442_s4, [#allocation10]  }
  0x54   :  { %254 = dma.done.wait [#allocation4], 256  }
  0x55   :  { %255 = vsyncadd [#allocation4], 4294967040 }
  0x56   :  { %256 = dma.done.wait [#allocation7], 512  }
  0x57   :  { %257 = vsyncadd [#allocation7], 4294966784 }
  0x58   :  { %258 = dma.done.wait [#allocation10], 256  }
  0x59   :  { %259 = vsyncadd [#allocation10], 4294967040 }
  0x5a   :  { %130 = vsyncpa [#allocation3], 1 }
  0x5b   :  { %131 = vsyncpa [#allocation4], 1 }
  0x5c   :  { %132 = vsyncpa [#allocation7], 1 }
  0x5d   :  { %133 = vsyncpa [#allocation10], 1 }

// kernel: tpu_custom_call.1
= control target key start
LH: loop header
LB: loop body
LE: loop exit
PB: predicated region body
PF: predicated region fallthrough
CT: control target
= control target key end

     0   :  { %13 = vsyncpa [#allocation3], 0  ;;  %s789_s0 = inlined_call_operand.hbm [shape: f32[4,512], index: 0, kind: input, shape index: {}]   ;;  %s790_s1 = inlined_call_operand.hbm [shape: f32[4,512], index: 1, kind: output, shape index: {0}]   ;;  %s791_s2 = inlined_call_operand.hbm [shape: f32[4,512], index: 2, kind: output, shape index: {1}]   ;;  %s792_s3 = inlined_call_operand.hbm [shape: f32[4,512], index: 3, kind: output, shape index: {2}]   ;;  %s793_s4 = inlined_call_operand.hbm [shape: f32[4,512], index: 4, kind: output, shape index: {3}]   ;;  %s794_s5 = inlined_call_operand.hbm [shape: s8[4,512], index: 5, kind: output, shape index: {4}]   ;;  %s795_s6 = inlined_call_operand.hbm [shape: s8[4,512], index: 6, kind: output, shape index: {5}]   ;;  %s796_s7 = inlined_call_operand.hbm [shape: s8[4,512], index: 7, kind: output, shape index: {6}]  }
   0x1   :  { %14 = vsyncpa [#allocation4], 0 }
   0x2   :  { %15 = vsyncpa [#allocation7], 0 }
   0x3   :  { %16 = vsyncpa [#allocation10], 0 }
   0x4   :  { %17 = vsyncpa [#allocation13], 0  ;;  %s543_s24 = smov [#allocation2]   ;;  %s357_s28 = scalar_lea.hbm %s789_s0, 256 }
   0x5   :  { %s24_s25 = sshll.u32 %s543_s24, 4  ;;  %p358_p0 = scmp.ne.s32.totalorder %s789_s0, %s357_s28  ;;  %s25_s25 = int_to_ptr.vmem [resolvable:$true] %s24_s25 }
   0x6   :  { %p361_p1 = scmp.lt.u32.totalorder %s357_s28, %s789_s0 }
   0x8   :  { %p363_p2 = pnand %p361_p1, %p358_p0 }
   0xa   :  { %366 = shalt.err (!%p363_p2)
}
   0xb   :  { %s367_s10 = scalar_lea.vmem %s25_s25, 256  ;;  %p372_p4 = scmp.lt.s32.totalorder %s25_s25, %s25_s25 }
   0xc   :  { %p368_p3 = scmp.ne.s32.totalorder %s25_s25, %s367_s10  ;;  %p373_p5 = scmp.lt.s32.totalorder %s367_s10, %s367_s10 }
   0xe   :  { %p374_p6 = por %p373_p5, %p372_p4 }
  0x10   :  { %p375_p7 = pnand %p374_p6, %p368_p3 }
  0x12   :  { %378 = shalt.err (!%p375_p7)
}
  0x13   :  { %27 = dma.hbm_to_vmem [thread:$0]  %s789_s0, 256, %s25_s25, [#allocation3]  }
  0x14   :  { %533 = dma.done.wait [#allocation3], 256  }
  0x15   :  { %534 = vsyncadd [#allocation3], 4294967040  ;;  %v544_v0 = vmov 1966171168   ;;  %v62_v2 = vlaneseq  ;;  %s545_s13 = smov [#allocation6]   ;;  %s546_s15 = smov [#allocation9]  }
  0x16   :  { %v605_v1 = vunpack.c.l.s4 %v544_v0  ;;  %s262_s14 = sshll.u32 %s545_s13, 4  ;;  %s282_s16 = sshll.u32 %s546_s15, 4  ;;  %v33_v3 = vld [vmem:[#allocation2] sm:$0xff]  ;;  %v607_v4 = vld [vmem:[#allocation2 + $0x8] sm:$0xff]  ;;  %v549_v13 = vmov 0   ;;  %s614_s14 = int_to_ptr.vmem [resolvable:$true] %s262_s14  ;;  %s618_s16 = int_to_ptr.vmem [resolvable:$true] %s282_s16 }
  0x17   :  { %v610_v6 = vshrl.u32 %v62_v2, 7  ;;  %s547_s17 = smov [#allocation5]   ;;  %s548_s0 = smov [#allocation8]   ;;  %v342_v7 = vadd.f32 -2.0, %v33_v3  ;;  %v343_v8 = vadd.f32 -2.0, %v607_v4  ;;  %v47_v9 = vmul.f32 0.5, %v33_v3 }
  0x18   :  { %v61_v5 = vunpack.c.0.s8 %v605_v1  ;;  %s252_s18 = sshll.u32 %s547_s17, 4  ;;  %s272_s19 = sshll.u32 %s548_s0, 4  ;;  %v48_v10 = vmul.f32 0.5, %v607_v4  ;;  %vm116_vm0 = vcmp.lt.f32.partialorder %v33_v3, 2.0  ;;  %vm117_vm1 = vcmp.lt.f32.partialorder %v607_v4, 2.0  ;;  %s623_s18 = int_to_ptr.vmem [resolvable:$true] %s252_s18  ;;  %s625_s19 = int_to_ptr.vmem [resolvable:$true] %s272_s19 }
  0x19   :  { %v35_v11 = vadd.f32 2.0, %v33_v3  ;;  %v36_v12 = vadd.f32 2.0, %v607_v4  ;;  %41 = vst [vmem:[#allocation6] sm:$0xff] %v342_v7  ;;  %42 = vst [vmem:[#allocation6 + $0x8] sm:$0xff] %v343_v8  ;;  %v118_v14 = vsel %vm116_vm0, 1, %v549_v13  ;;  %v119_v15 = vsel %vm117_vm1, 1, %v549_v13  ;;  %p384_p9 = scmp.lt.s32.totalorder %s614_s14, %s614_s14 }
  0x1a   :  { %49 = vst [vmem:[#allocation9] sm:$0xff] %v47_v9  ;;  %50 = vst [vmem:[#allocation9 + $0x8] sm:$0xff] %v48_v10  ;;  %v43_v16 = vmul.f32 2.0, %v33_v3  ;;  %v44_v17 = vmul.f32 2.0, %v607_v4  ;;  %v627_v18 = vpack.c.b16 %v119_v15, %v118_v14  ;;  %vm51_vm2 = vcmp.eq.f32.partialorder %v33_v3, 2.0  ;;  %s379_s20 = scalar_lea.vmem %s614_s14, 256 }
  0x1b   :  { %37 = vst [vmem:[#allocation5] sm:$0xff] %v35_v11  ;;  %38 = vst [vmem:[#allocation5 + $0x8] sm:$0xff] %v36_v12  ;;  %vm52_vm3 = vcmp.eq.f32.partialorder %v607_v4, 2.0  ;;  %vm181_vm4 = vcmp.gt.f32.partialorder %v33_v3, 2.0  ;;  %p380_p8 = scmp.ne.s32.totalorder %s614_s14, %s379_s20  ;;  %p385_p10 = scmp.lt.s32.totalorder %s379_s20, %s379_s20 }
  0x1d   :  { %p386_p11 = por %p385_p10, %p384_p9 }
  0x1f   :  { %p387_p12 = pnand %p386_p11, %p380_p8 }
  0x21   :  { %390 = shalt.err (!%p387_p12)
}
  0x22   :  { %s391_s23 = scalar_lea.hbm %s791_s2, 256 }
  0x23   :  { %p392_p13 = scmp.ne.s32.totalorder %s791_s2, %s391_s23  ;;  %p395_p0 = scmp.lt.u32.totalorder %s391_s23, %s791_s2 }
  0x25   :  { %p397_p1 = pnand %p395_p0, %p392_p13 }
  0x27   :  { %400 = shalt.err (!%p397_p1)
}
  0x28   :  { %265 = dma.vmem_to_hbm [thread:$0]  %s614_s14, 256, %s791_s2, [#allocation7]   ;;  %45 = vst [vmem:[#allocation8] sm:$0xff] %v43_v16  ;;  %46 = vst [vmem:[#allocation8 + $0x8] sm:$0xff] %v44_v17  ;;  %v53_v19 = vsel %vm51_vm2, 1, %v549_v13  ;;  %v54_v20 = vsel %vm52_vm3, 1, %v549_v13 }
  0x29   :  { %vm182_vm5 = vcmp.gt.f32.partialorder %v607_v4, 2.0  ;;  %v183_v21 = vsel %vm181_vm4, 1, %v549_v13  ;;  %s401_s30 = scalar_lea.vmem %s618_s16, 256  ;;  %p406_p3 = scmp.lt.s32.totalorder %s618_s16, %s618_s16 }
  0x2a   :  { %p402_p2 = scmp.ne.s32.totalorder %s618_s16, %s401_s30  ;;  %p407_p4 = scmp.lt.s32.totalorder %s401_s30, %s401_s30 }
  0x2c   :  { %p408_p5 = por %p407_p4, %p406_p3 }
  0x2e   :  { %p409_p6 = pnand %p408_p5, %p402_p2 }
  0x30   :  { %412 = shalt.err (!%p409_p6)
}
  0x31   :  { %s413_s9 = scalar_lea.hbm %s793_s4, 256 }
  0x32   :  { %p414_p7 = scmp.ne.s32.totalorder %s793_s4, %s413_s9  ;;  %p417_p8 = scmp.lt.u32.totalorder %s413_s9, %s793_s4 }
  0x34   :  { %p419_p9 = pnand %p417_p8, %p414_p7 }
  0x36   :  { %422 = shalt.err (!%p419_p9)
}
  0x37   :  { %285 = dma.vmem_to_hbm [thread:$0]  %s618_s16, 256, %s793_s4, [#allocation10]   ;;  %v675_v22 = vsub.s32 %v61_v5, %v610_v6  ;;  %v121_v23 = vpack.c.b8 %v627_v18, %v627_v18  ;;  %v55_v24 = vpack.c.b16 %v54_v20, %v53_v19  ;;  %v184_v25 = vsel %vm182_vm5, 1, %v549_v13 }
  0x38   :  { %s423_s17 = scalar_lea.vmem %s623_s18, 256  ;;  %p428_p11 = scmp.lt.s32.totalorder %s623_s18, %s623_s18 }
  0x39   :  { %p424_p10 = scmp.ne.s32.totalorder %s623_s18, %s423_s17  ;;  %p429_p12 = scmp.lt.s32.totalorder %s423_s17, %s423_s17 }
  0x3b   :  { %p430_p13 = por %p429_p12, %p428_p11 }
  0x3d   :  { %p431_p0 = pnand %p430_p13, %p424_p10 }
  0x3f   :  { %434 = shalt.err (!%p431_p0)
}
  0x40   :  { %s435_s0 = scalar_lea.hbm %s790_s1, 256 }
  0x41   :  { %p436_p1 = scmp.ne.s32.totalorder %s790_s1, %s435_s0  ;;  %p439_p2 = scmp.lt.u32.totalorder %s435_s0, %s790_s1 }
  0x43   :  { %p441_p3 = pnand %p439_p2, %p436_p1 }
  0x45   :  { %444 = shalt.err (!%p441_p3)
}
  0x46   :  { %255 = dma.vmem_to_hbm [thread:$0]  %s623_s18, 256, %s790_s1, [#allocation4]   ;;  %v185_v26 = vpack.c.b16 %v184_v25, %v183_v21 }
  0x47   :  { %s445_s26 = scalar_lea.vmem %s625_s19, 256  ;;  %p450_p5 = scmp.lt.s32.totalorder %s625_s19, %s625_s19 }
  0x48   :  { %p446_p4 = scmp.ne.s32.totalorder %s625_s19, %s445_s26  ;;  %p451_p6 = scmp.lt.s32.totalorder %s445_s26, %s445_s26 }
  0x4a   :  { %p452_p7 = por %p451_p6, %p450_p5 }
  0x4c   :  { %p453_p8 = pnand %p452_p7, %p446_p4 }
  0x4e   :  { %456 = shalt.err (!%p453_p8)
}
  0x4f   :  { %s457_s29 = scalar_lea.hbm %s792_s3, 256 }
  0x50   :  { %p458_p9 = scmp.ne.s32.totalorder %s792_s3, %s457_s29  ;;  %p461_p10 = scmp.lt.u32.totalorder %s457_s29, %s792_s3 }
  0x52   :  { %p463_p11 = pnand %p461_p10, %p458_p9 }
  0x54   :  { %466 = shalt.err (!%p463_p11)
}
  0x55   :  { %275 = dma.vmem_to_hbm [thread:$0]  %s625_s19, 256, %s792_s3, [#allocation7]   ;;  %vm122_vm6 = vnez %v121_v23  ;;  %v56_v27 = vpack.c.b8 %v55_v24, %v55_v24  ;;  %v186_v29 = vpack.c.b8 %v185_v26, %v185_v26 }
  0x56   :  { %v123_v28 = vsel %vm122_vm6, 16843009, %v549_v13  ;;  %s550_s3 = smov [#allocation12]   ;;  %s551_s10 = smov [#allocation11]  }
  0x57   :  { %v130_v30 = vrot.slane %v123_v28, %v675_v22  ;;  %vm57_vm7 = vnez %v56_v27  ;;  %vm187_vm8 = vnez %v186_v29  ;;  %s302_s19 = sshll.u32 %s550_s3, 4  ;;  %s292_s11 = sshll.u32 %s551_s10, 4  ;;  %s303_s19 = int_to_ptr.vmem [resolvable:$true] %s302_s19  ;;  %s744_s11 = int_to_ptr.vmem [resolvable:$true] %s292_s11 }
  0x58   :  { %v58_v31 = vsel %vm57_vm7, 16843009, %v549_v13  ;;  %v188_v35 = vsel %vm187_vm8, 16843009, %v549_v13  ;;  %s467_s12 = scalar_lea.vmem %s303_s19, 64  ;;  %p472_p13 = scmp.lt.s32.totalorder %s303_s19, %s303_s19 }
  0x59   :  { %v131_v32 = vcombine.high %v130_v30, %v130_v30  ;;  %v138_v33 = vrot.slane %v130_v30, %v675_v22  ;;  %v65_v34 = vrot.slane %v58_v31, %v675_v22  ;;  %v195_v36 = vrot.slane %v188_v35, %v675_v22  ;;  %p468_p12 = scmp.ne.s32.totalorder %s303_s19, %s467_s12  ;;  %p473_p0 = scmp.lt.s32.totalorder %s467_s12, %s467_s12 }
  0x5b   :  { %v145_v37 = vrot.slane %v131_v32, %v675_v22  ;;  %v146_v38 = vcombine.high %v138_v33, %v138_v33  ;;  %vm148_vm9 = vnez %v138_v33  ;;  %v66_v39 = vcombine.high %v65_v34, %v65_v34  ;;  %p474_p1 = por %p473_p0, %p472_p13 }
  0x5c   :  { %v152_v40 = vsel %vm148_vm9, 16843009, %v549_v13  ;;  %v73_v41 = vrot.slane %v65_v34, %v675_v22  ;;  %v196_v42 = vcombine.high %v195_v36, %v195_v36  ;;  %v203_v43 = vrot.slane %v195_v36, %v675_v22 }
  0x5d   :  { %v147_v44 = vcombine.high %v145_v37, %v145_v37  ;;  %vm149_vm10 = vnez %v145_v37  ;;  %vm150_vm11 = vnez %v146_v38  ;;  %v80_v45 = vrot.slane %v66_v39, %v675_v22  ;;  %p475_p2 = pnand %p474_p1, %p468_p12 }
  0x5e   :  { %v153_v46 = vsel %vm149_vm10, 16843009, %v549_v13  ;;  %v154_v47 = vsel %vm150_vm11, 16843009, %v549_v13  ;;  %v81_v48 = vcombine.high %v73_v41, %v73_v41  ;;  %vm83_vm12 = vnez %v73_v41 }
  0x5f   :  { %vm151_vm13 = vnez %v147_v44  ;;  %v156_v49 = vcombine.low %v152_v40, %v153_v46  ;;  %v82_v50 = vcombine.high %v80_v45, %v80_v45  ;;  %vm84_vm14 = vnez %v80_v45 }
  0x60   :  { %v155_v51 = vsel %vm151_vm13, 16843009, %v549_v13  ;;  %vm85_vm15 = vnez %v81_v48  ;;  %v87_v52 = vsel %vm83_vm12, 16843009, %v549_v13  ;;  %v88_v53 = vsel %vm84_vm14, 16843009, %v549_v13 }
  0x61   :  { %v157_v54 = vcombine.low %v154_v47, %v155_v51  ;;  %v164_v55 = vrot.slane %v156_v49, %v675_v22  ;;  %vm86_vm0 = vnez %v82_v50  ;;  %v89_v56 = vsel %vm85_vm15, 16843009, %v549_v13 }
  0x62   :  { %v90_v57 = vsel %vm86_vm0, 16843009, %v549_v13  ;;  %v91_v58 = vcombine.low %v87_v52, %v88_v53  ;;  %v210_v59 = vrot.slane %v196_v42, %v675_v22  ;;  %v211_v60 = vcombine.high %v203_v43, %v203_v43 }
  0x63   :  { %v171_v61 = vrot.slane %v157_v54, %v675_v22  ;;  %v92_v62 = vcombine.low %v89_v56, %v90_v57  ;;  %vm213_vm1 = vnez %v203_v43 }
  0x64   :  { %v99_v63 = vrot.slane %v91_v58, %v675_v22  ;;  %v212_v0 = vcombine.high %v210_v59, %v210_v59  ;;  %vm214_vm2 = vnez %v210_v59  ;;  %vm215_vm3 = vnez %v211_v60 }
  0x65   :  { %v172_v1 = vcombine.low %v164_v55, %v171_v61  ;;  %v106_v2 = vrot.slane %v92_v62, %v675_v22  ;;  %v217_v3 = vsel %vm213_vm1, 16843009, %v549_v13  ;;  %v218_v4 = vsel %vm214_vm2, 16843009, %v549_v13 }
  0x66   :  { %vm216_vm4 = vnez %v212_v0  ;;  %v219_v5 = vsel %vm215_vm3, 16843009, %v549_v13  ;;  %v221_v6 = vcombine.low %v217_v3, %v218_v4 }
  0x67   :  { %345 = vst.sshfl [vmem:[#allocation12] sm:$0x55 pattern:$0x73625140] %v172_v1  ;;  %v107_v7 = vcombine.low %v99_v63, %v106_v2  ;;  %v220_v8 = vsel %vm216_vm4, 16843009, %v549_v13 }
  0x68   :  { %v222_v9 = vcombine.low %v219_v5, %v220_v8  ;;  %v229_v10 = vrot.slane %v221_v6, %v675_v22 }
  0x69   :  { %478 = shalt.err (!%p475_p2)
}
  0x6a   :  { %s479_s15 = scalar_lea.hbm %s795_s6, 64 }
  0x6b   :  { %p480_p3 = scmp.ne.s32.totalorder %s795_s6, %s479_s15  ;;  %p483_p4 = scmp.lt.u32.totalorder %s479_s15, %s795_s6 }
  0x6d   :  { %p485_p5 = pnand %p483_p4, %p480_p3 }
  0x6f   :  { %488 = shalt.err (!%p485_p5)
}
  0x70   :  { %305 = dma.vmem_to_hbm [thread:$0]  %s303_s19, 64, %s795_s6, [#allocation13]   ;;  %344 = vst.sshfl [vmem:[#allocation11] sm:$0x55 pattern:$0x73625140] %v107_v7  ;;  %v236_v11 = vrot.slane %v222_v9, %v675_v22 }
  0x71   :  { %s552_s22 = smov [#allocation14]   ;;  %s489_s24 = scalar_lea.vmem %s744_s11, 64 }
  0x72   :  { %s312_s23 = sshll.u32 %s552_s22, 4  ;;  %p490_p6 = scmp.ne.s32.totalorder %s744_s11, %s489_s24  ;;  %s313_s23 = int_to_ptr.vmem [resolvable:$true] %s312_s23 }
  0x73   :  { %p494_p7 = scmp.lt.s32.totalorder %s744_s11, %s744_s11  ;;  %p495_p8 = scmp.lt.s32.totalorder %s489_s24, %s489_s24 }
  0x75   :  { %p496_p9 = por %p495_p8, %p494_p7 }
  0x77   :  { %p497_p10 = pnand %p496_p9, %p490_p6 }
  0x79   :  { %500 = shalt.err (!%p497_p10)
}
  0x7a   :  { %s501_s27 = scalar_lea.hbm %s794_s5, 64 }
  0x7b   :  { %p502_p11 = scmp.ne.s32.totalorder %s794_s5, %s501_s27  ;;  %p505_p12 = scmp.lt.u32.totalorder %s501_s27, %s794_s5 }
  0x7d   :  { %p507_p13 = pnand %p505_p12, %p502_p11 }
  0x7f   :  { %510 = shalt.err (!%p507_p13)
}
  0x80   :  { %295 = dma.vmem_to_hbm [thread:$0]  %s744_s11, 64, %s794_s5, [#allocation10]   ;;  %v237_v12 = vcombine.low %v229_v10, %v236_v11 }
  0x81   :  { %s511_s9 = scalar_lea.vmem %s313_s23, 64  ;;  %p516_p1 = scmp.lt.s32.totalorder %s313_s23, %s313_s23 }
  0x82   :  { %346 = vst.sshfl [vmem:[#allocation14] sm:$0x55 pattern:$0x73625140] %v237_v12  ;;  %p512_p0 = scmp.ne.s32.totalorder %s313_s23, %s511_s9  ;;  %p517_p2 = scmp.lt.s32.totalorder %s511_s9, %s511_s9 }
  0x84   :  { %p518_p3 = por %p517_p2, %p516_p1 }
  0x86   :  { %p519_p4 = pnand %p518_p3, %p512_p0 }
  0x88   :  { %522 = shalt.err (!%p519_p4)
}
  0x89   :  { %s523_s3 = scalar_lea.hbm %s796_s7, 64 }
  0x8a   :  { %p524_p5 = scmp.ne.s32.totalorder %s796_s7, %s523_s3  ;;  %p527_p6 = scmp.lt.u32.totalorder %s523_s3, %s796_s7 }
  0x8c   :  { %p529_p7 = pnand %p527_p6, %p524_p5 }
  0x8e   :  { %532 = shalt.err (!%p529_p7)
}
  0x8f   :  { %315 = dma.vmem_to_hbm [thread:$0]  %s313_s23, 64, %s796_s7, [#allocation13]  }
  0x90   :  { %535 = dma.done.wait [#allocation4], 256  }
  0x91   :  { %536 = vsyncadd [#allocation4], 4294967040 }
  0x92   :  { %537 = dma.done.wait [#allocation7], 512  }
  0x93   :  { %538 = vsyncadd [#allocation7], 4294966784 }
  0x94   :  { %539 = dma.done.wait [#allocation10], 320  }
  0x95   :  { %540 = vsyncadd [#allocation10], 4294966976 }
  0x96   :  { %541 = dma.done.wait [#allocation13], 128  }
  0x97   :  { %542 = vsyncadd [#allocation13], 4294967168 }
  0x98   :  { %337 = vsyncpa [#allocation3], 1 }
  0x99   :  { %338 = vsyncpa [#allocation4], 1 }
  0x9a   :  { %339 = vsyncpa [#allocation7], 1 }
  0x9b   :  { %340 = vsyncpa [#allocation10], 1 }
  0x9c   :  { %341 = vsyncpa [#allocation13], 1 }

</bundles_post_ra>
